<compile_context>
chip_gen: v6e
topology: v6e:2x2x1
jax: 0.10.0
libtpu: 0.0.40
codegen_flags: <defaults>
</compile_context>

<pallas_src>
import functools
import math

import jax
import jax.numpy as jnp
from jax import lax
from jax.experimental import pallas as pl
from jax.experimental.pallas import tpu as pltpu


def _gelu_tanh(x):
    # TODO(synk): PyTorch nn.GELU() default is the exact erf form; the tanh
    # approximation is used because erf lowering is not guaranteed in Mosaic.
    c = math.sqrt(2.0 / math.pi)
    return 0.5 * x * (1.0 + jnp.tanh(c * (x + 0.044715 * x * x * x)))


def _layer_norm(x, gamma, beta, eps):
    mu = jnp.mean(x, axis=-1, keepdims=True)
    var = jnp.mean((x - mu) ** 2, axis=-1, keepdims=True)
    return (x - mu) * lax.rsqrt(var + eps) * gamma + beta


def _vit_block_kernel(
    x_ref, ln1_g_ref, ln1_b_ref, wqkv_ref, *rest,
    num_heads, head_dim, scale, eps, has_qkv_bias,
):
    if has_qkv_bias:
        bqkv_ref = rest[0]
        rest = rest[1:]
    (wproj_ref, bproj_ref, ln2_g_ref, ln2_b_ref,
     wfc1_ref, bfc1_ref, wfc2_ref, bfc2_ref, o_ref) = rest

    f32 = jnp.float32
    bf16 = jnp.bfloat16

    x = x_ref[0].astype(f32)                               # (N, D): one batch element
    n, d = x.shape

    # ---- norm1 (f32 stats) + fused QKV projection (bf16 MXU, f32 accumulate) ----
    xn = _layer_norm(x, ln1_g_ref[...], ln1_b_ref[...], eps)
    qkv = jnp.dot(xn.astype(bf16), wqkv_ref[...],
                  preferred_element_type=f32)              # (N, 3D)
    if has_qkv_bias:
        qkv = qkv + bqkv_ref[...]

    # ---- batched multi-head self-attention ----
    # (N, 3D) -> (3H, N, hd): one relayout; heads become a leading batch dim.
    qkv_h = jnp.transpose(qkv.reshape(n, 3 * num_heads, head_dim), (1, 0, 2))
    q = qkv_h[:num_heads].astype(bf16)                     # (H, N, hd)
    k = qkv_h[num_heads:2 * num_heads].astype(bf16)
    v = qkv_h[2 * num_heads:].astype(bf16)

    s = jnp.einsum("hqd,hkd->hqk", q, k,
                   preferred_element_type=f32) * scale     # (H, N, N), f32
    s = s - jnp.max(s, axis=-1, keepdims=True)
    p = jnp.exp(s)
    p = p * pl.reciprocal(jnp.sum(p, axis=-1, keepdims=True), approx=True)
    ctx = jnp.einsum("hqk,hkd->hqd", p.astype(bf16), v,
                     preferred_element_type=f32)           # (H, N, hd)
    # back to token-major: == PyTorch (attn @ v).transpose(1, 2).reshape(b, n, c)
    ctx = jnp.transpose(ctx, (1, 0, 2)).reshape(n, d)

    proj = jnp.dot(ctx.astype(bf16), wproj_ref[...], preferred_element_type=f32)
    x1 = x + proj + bproj_ref[...]                         # residual 1 (f32)

    # ---- norm2 + MLP (fc1 -> GELU -> fc2) ----
    xn2 = _layer_norm(x1, ln2_g_ref[...], ln2_b_ref[...], eps)
    h1 = jnp.dot(xn2.astype(bf16), wfc1_ref[...], preferred_element_type=f32)
    h1 = _gelu_tanh(h1 + bfc1_ref[...])
    h2 = jnp.dot(h1.astype(bf16), wfc2_ref[...], preferred_element_type=f32)
    o_ref[0] = (x1 + h2 + bfc2_ref[...]).astype(o_ref.dtype)   # residual 2


def vit_block_forward(x, params, *, num_heads, eps=1e-5):
    """x: (B, N, D); params follow PyTorch layouts (Linear weight is (out, in))."""
    B, N, D = x.shape
    assert D % num_heads == 0
    head_dim = D // num_heads
    scale = head_dim ** (-0.5)
    Dh = params["fc1_w"].shape[0]
    f32, bf16 = jnp.float32, jnp.bfloat16

    # Trace-time weight prep: transpose so the kernel computes x @ W, store bf16.
    wqkv = params["qkv_w"].T.astype(bf16)                  # (D, 3D)
    wproj = params["proj_w"].T.astype(bf16)                # (D, D)
    wfc1 = params["fc1_w"].T.astype(bf16)                  # (D, Dh)
    wfc2 = params["fc2_w"].T.astype(bf16)                  # (Dh, D)
    bproj = params["proj_b"].reshape(1, D).astype(f32)
    bfc1 = params["fc1_b"].reshape(1, Dh).astype(f32)
    bfc2 = params["fc2_b"].reshape(1, D).astype(f32)
    ln1_g = params["ln1_g"].reshape(1, D).astype(f32)
    ln1_b = params["ln1_b"].reshape(1, D).astype(f32)
    ln2_g = params["ln2_g"].reshape(1, D).astype(f32)
    ln2_b = params["ln2_b"].reshape(1, D).astype(f32)
    qkv_b = params.get("qkv_b", None)
    has_qkv_bias = qkv_b is not None                       # qkv_bias=False drops operand

    kernel = functools.partial(
        _vit_block_kernel, num_heads=num_heads, head_dim=head_dim,
        scale=scale, eps=eps, has_qkv_bias=has_qkv_bias)

    # Constant block index + single buffer => DMA'd once, VMEM-resident for the whole grid.
    def resident(shape):
        return pl.BlockSpec(shape, lambda b: (0, 0), pipeline_mode=pl.Buffered(1))

    operands = [x, ln1_g, ln1_b, wqkv]
    in_specs = [
        pl.BlockSpec((1, N, D), lambda b: (b, 0, 0)),      # x: streamed, double-buffered
        resident((1, D)), resident((1, D)),                # norm1 gamma / beta
        resident((D, 3 * D)),                              # fused qkv weight
    ]
    if has_qkv_bias:
        operands.append(qkv_b.reshape(1, 3 * D).astype(f32))
        in_specs.append(resident((1, 3 * D)))
    operands += [wproj, bproj, ln2_g, ln2_b, wfc1, bfc1, wfc2, bfc2]
    in_specs += [
        resident((D, D)), resident((1, D)),                # proj W / b
        resident((1, D)), resident((1, D)),                # norm2 gamma / beta
        resident((D, Dh)), resident((1, Dh)),              # fc1 W / b
        resident((Dh, D)), resident((1, D)),               # fc2 W / b
    ]

    flops = (2 * B * N * D * (3 * D)        # qkv
             + 4 * B * N * N * D            # scores + attn@v
             + 2 * B * N * D * D            # proj
             + 4 * B * N * D * Dh)          # fc1 + fc2
    transcendentals = B * num_heads * N * N + B * N * Dh
    param_bytes = sum(int(a.size) * a.dtype.itemsize for a in operands[1:])
    bytes_accessed = 2 * int(x.size) * x.dtype.itemsize + param_bytes

    # VMEM budget: single-buffered residents + double-buffered x/out tiles + in-kernel
    # intermediates (qkv, head-major copy, HxNxN scores, MLP hidden), with 2x headroom.
    per_step_bytes = 4 * (4 * N * D                        # x / out double buffers
                          + 3 * N * 3 * D                  # qkv + head-major + bf16 copies
                          + 2 * num_heads * N * N          # scores + probs
                          + 2 * N * Dh)                    # fc1 activation
    vmem_limit = int(min(64 * 1024 * 1024,
                         max(32 * 1024 * 1024, 2 * (param_bytes + per_step_bytes))))

    return pl.pallas_call(
        kernel,
        out_shape=jax.ShapeDtypeStruct((B, N, D), x.dtype),
        grid_spec=pltpu.PrefetchScalarGridSpec(
            num_scalar_prefetch=0,
            # TODO(synk): add a second parallel axis (N row-tiles) so both v7x
            # TensorCores stay busy when B == 1.
            grid=(B,),
            in_specs=in_specs,
            out_specs=pl.BlockSpec((1, N, D), lambda b: (b, 0, 0)),
        ),
        compiler_params=pltpu.CompilerParams(
            dimension_semantics=("parallel",),
            vmem_limit_bytes=vmem_limit),
        cost_estimate=pl.CostEstimate(
            flops=flops, transcendentals=transcendentals,
            bytes_accessed=bytes_accessed),
    )(*operands)


if __name__ == "__main__":
    # Small shapes consistent with the module: batch=2, seq=8, dim=32, 4 heads, mlp x4.
    B, N, D = 2, 8, 32
    num_heads = 4
    Dh = int(D * 4.0)
    eps = 1e-5
    w_scale = 0.05

    key = jax.random.PRNGKey(0)
    ks = jax.random.split(key, 12)
    x = jax.random.normal(ks[0], (B, N, D), dtype=jnp.float32)
    params = {
        "ln1_g": 1.0 + 0.1 * jax.random.normal(ks[1], (D,), jnp.float32),
        "ln1_b": 0.1 * jax.random.normal(ks[2], (D,), jnp.float32),
        "qkv_w": w_scale * jax.random.normal(ks[3], (3 * D, D), jnp.float32),
        "qkv_b": None,   # qkv_bias=False (module default)
        "proj_w": w_scale * jax.random.normal(ks[4], (D, D), jnp.float32),
        "proj_b": w_scale * jax.random.normal(ks[5], (D,), jnp.float32),
        "ln2_g": 1.0 + 0.1 * jax.random.normal(ks[6], (D,), jnp.float32),
        "ln2_b": 0.1 * jax.random.normal(ks[7], (D,), jnp.float32),
        "fc1_w": w_scale * jax.random.normal(ks[8], (Dh, D), jnp.float32),
        "fc1_b": w_scale * jax.random.normal(ks[9], (Dh,), jnp.float32),
        "fc2_w": w_scale * jax.random.normal(ks[10], (D, Dh), jnp.float32),
        "fc2_b": w_scale * jax.random.normal(ks[11], (D,), jnp.float32),
    }

    y = vit_block_forward(x, params, num_heads=num_heads, eps=eps)
    y = jax.block_until_ready(y)

    # ---- pure-JAX f32 reference with the same (intended) PyTorch semantics ----
    def reference(xr):
        hi = jax.lax.Precision.HIGHEST

        def ln(v, g, b):
            mu = v.mean(-1, keepdims=True)
            var = ((v - mu) ** 2).mean(-1, keepdims=True)
            return (v - mu) / jnp.sqrt(var + eps) * g + b

        hd = D // num_heads
        xn = ln(xr, params["ln1_g"], params["ln1_b"])
        qkv = jnp.einsum("bnd,ed->bne", xn, params["qkv_w"], precision=hi)
        qkv = qkv.reshape(B, N, 3, num_heads, hd).transpose(2, 0, 3, 1, 4)
        q, k, v = qkv[0], qkv[1], qkv[2]
        attn = jnp.einsum("bhqe,bhke->bhqk", q, k, precision=hi) * (hd ** -0.5)
        attn = jax.nn.softmax(attn, axis=-1)
        out = jnp.einsum("bhqk,bhke->bhqe", attn, v, precision=hi)
        out = out.transpose(0, 2, 1, 3).reshape(B, N, D)
        out = jnp.einsum("bnd,ed->bne", out, params["proj_w"], precision=hi)
        x1 = xr + out + params["proj_b"]
        xn2 = ln(x1, params["ln2_g"], params["ln2_b"])
        h = jnp.einsum("bnd,ed->bne", xn2, params["fc1_w"], precision=hi)
        h = _gelu_tanh(h + params["fc1_b"])
        y2 = jnp.einsum("bnh,eh->bne", h, params["fc2_w"], precision=hi)
        return x1 + y2 + params["fc2_b"]

    ref = reference(x)
    assert y.shape == (B, N, D)
    # Kernel runs its matmuls in bf16 (f32 accumulate), so tolerance is widened vs. f32.
    assert jnp.allclose(y, ref, atol=2e-2, rtol=2e-2), \
        f"max abs diff = {float(jnp.max(jnp.abs(y - ref)))}"

    print("KERNEL_OK")
</pallas_src>

<mosaic_0001>
module attributes {stable_mosaic.version = 11 : i64} {
  func.func @_vit_block_kernel(%arg0: i32, %arg1: memref<1x8x32xf32, #tpu.memory_space<vmem>>, %arg2: memref<1x32xf32, #tpu.memory_space<vmem>>, %arg3: memref<1x32xf32, #tpu.memory_space<vmem>>, %arg4: memref<32x96xbf16, #tpu.memory_space<vmem>>, %arg5: memref<32x32xbf16, #tpu.memory_space<vmem>>, %arg6: memref<1x32xf32, #tpu.memory_space<vmem>>, %arg7: memref<1x32xf32, #tpu.memory_space<vmem>>, %arg8: memref<1x32xf32, #tpu.memory_space<vmem>>, %arg9: memref<32x128xbf16, #tpu.memory_space<vmem>>, %arg10: memref<1x128xf32, #tpu.memory_space<vmem>>, %arg11: memref<128x32xbf16, #tpu.memory_space<vmem>>, %arg12: memref<1x32xf32, #tpu.memory_space<vmem>>, %arg13: memref<1x8x32xf32, #tpu.memory_space<vmem>>) attributes {dimension_semantics = [#tpu.dimension_semantics<parallel>], iteration_bounds = array<i64: 2>, scalar_prefetch = 0 : i64, scratch_operands = 0 : i64, tpu.core_type = #tpu.core_type<tc>, window_params = [{transform_indices = @transform_0, window_bounds = array<i64: 1, 8, 32>}, {pipeline_mode = #tpu.pipeline_mode<synchronous>, transform_indices = @transform_1, window_bounds = array<i64: 1, 32>}, {pipeline_mode = #tpu.pipeline_mode<synchronous>, transform_indices = @transform_2, window_bounds = array<i64: 1, 32>}, {pipeline_mode = #tpu.pipeline_mode<synchronous>, transform_indices = @transform_3, window_bounds = array<i64: 32, 96>}, {pipeline_mode = #tpu.pipeline_mode<synchronous>, transform_indices = @transform_4, window_bounds = array<i64: 32, 32>}, {pipeline_mode = #tpu.pipeline_mode<synchronous>, transform_indices = @transform_5, window_bounds = array<i64: 1, 32>}, {pipeline_mode = #tpu.pipeline_mode<synchronous>, transform_indices = @transform_6, window_bounds = array<i64: 1, 32>}, {pipeline_mode = #tpu.pipeline_mode<synchronous>, transform_indices = @transform_7, window_bounds = array<i64: 1, 32>}, {pipeline_mode = #tpu.pipeline_mode<synchronous>, transform_indices = @transform_8, window_bounds = array<i64: 32, 128>}, {pipeline_mode = #tpu.pipeline_mode<synchronous>, transform_indices = @transform_9, window_bounds = array<i64: 1, 128>}, {pipeline_mode = #tpu.pipeline_mode<synchronous>, transform_indices = @transform_10, window_bounds = array<i64: 128, 32>}, {pipeline_mode = #tpu.pipeline_mode<synchronous>, transform_indices = @transform_11, window_bounds = array<i64: 1, 32>}, {transform_indices = @transform_12, window_bounds = array<i64: 1, 8, 32>}]} {
    %c0 = arith.constant 0 : index
    %c0_0 = arith.constant 0 : index
    %c0_1 = arith.constant 0 : index
    %0 = vector.load %arg1[%c0, %c0_0, %c0_1] : memref<1x8x32xf32, #tpu.memory_space<vmem>>, vector<1x8x32xf32>
    %1 = vector.shape_cast %0 : vector<1x8x32xf32> to vector<8x32xf32>
    %c0_2 = arith.constant 0 : index
    %c0_3 = arith.constant 0 : index
    %2 = vector.load %arg2[%c0_2, %c0_3] : memref<1x32xf32, #tpu.memory_space<vmem>>, vector<1x32xf32>
    %c0_4 = arith.constant 0 : index
    %c0_5 = arith.constant 0 : index
    %3 = vector.load %arg3[%c0_4, %c0_5] : memref<1x32xf32, #tpu.memory_space<vmem>>, vector<1x32xf32>
    %cst = arith.constant dense<0.000000e+00> : vector<8xf32>
    %4 = vector.multi_reduction <add>, %1, %cst [1] : vector<8x32xf32> to vector<8xf32>
    %5 = vector.shape_cast %4 : vector<8xf32> to vector<8x1xf32>
    %cst_6 = arith.constant 3.200000e+01 : f32
    %6 = vector.broadcast %cst_6 : f32 to vector<8x1xf32>
    %7 = arith.divf %5, %6 : vector<8x1xf32>
    %8 = vector.broadcast %7 : vector<8x1xf32> to vector<8x32xf32>
    %9 = arith.subf %1, %8 : vector<8x32xf32>
    %10 = arith.mulf %9, %9 : vector<8x32xf32>
    %cst_7 = arith.constant dense<0.000000e+00> : vector<8xf32>
    %11 = vector.multi_reduction <add>, %10, %cst_7 [1] : vector<8x32xf32> to vector<8xf32>
    %12 = vector.shape_cast %11 : vector<8xf32> to vector<8x1xf32>
    %cst_8 = arith.constant 3.200000e+01 : f32
    %13 = vector.broadcast %cst_8 : f32 to vector<8x1xf32>
    %14 = arith.divf %12, %13 : vector<8x1xf32>
    %15 = vector.broadcast %7 : vector<8x1xf32> to vector<8x32xf32>
    %16 = arith.subf %1, %15 : vector<8x32xf32>
    %cst_9 = arith.constant 9.99999974E-6 : f32
    %17 = vector.broadcast %cst_9 : f32 to vector<8x1xf32>
    %18 = arith.addf %14, %17 : vector<8x1xf32>
    %19 = math.rsqrt %18 : vector<8x1xf32>
    %20 = vector.broadcast %19 : vector<8x1xf32> to vector<8x32xf32>
    %21 = arith.mulf %16, %20 : vector<8x32xf32>
    %22 = vector.broadcast %2 : vector<1x32xf32> to vector<8x32xf32>
    %23 = arith.mulf %21, %22 : vector<8x32xf32>
    %24 = vector.broadcast %3 : vector<1x32xf32> to vector<8x32xf32>
    %25 = arith.addf %23, %24 : vector<8x32xf32>
    %26 = arith.truncf %25 : vector<8x32xf32> to vector<8x32xbf16>
    %c0_10 = arith.constant 0 : index
    %c0_11 = arith.constant 0 : index
    %27 = vector.load %arg4[%c0_10, %c0_11] : memref<32x96xbf16, #tpu.memory_space<vmem>>, vector<32x96xbf16>
    %cst_12 = arith.constant dense<0.000000e+00> : vector<8x96xf32>
    %28 = tpu.matmul %26, %27, %cst_12 {dimension_numbers = #tpu.dot_dimension_numbers<[1], [0], [0], [1], [0, 0, 1, 1], [], []>} : vector<8x32xbf16>, vector<32x96xbf16>, vector<8x96xf32> -> vector<8x96xf32>
    %29 = vector.shape_cast %28 : vector<8x96xf32> to vector<8x12x8xf32>
    %30 = tpu.transpose %29, [1, 0, 2] : vector<8x12x8xf32> -> vector<12x8x8xf32>
    %31 = vector.extract_strided_slice %30 {offsets = [0, 0, 0], sizes = [4, 8, 8], strides = [1, 1, 1]} : vector<12x8x8xf32> to vector<4x8x8xf32>
    %32 = arith.truncf %31 : vector<4x8x8xf32> to vector<4x8x8xbf16>
    %33 = vector.extract_strided_slice %30 {offsets = [4, 0, 0], sizes = [4, 8, 8], strides = [1, 1, 1]} : vector<12x8x8xf32> to vector<4x8x8xf32>
    %34 = arith.truncf %33 : vector<4x8x8xf32> to vector<4x8x8xbf16>
    %35 = vector.extract_strided_slice %30 {offsets = [8, 0, 0], sizes = [4, 8, 8], strides = [1, 1, 1]} : vector<12x8x8xf32> to vector<4x8x8xf32>
    %36 = arith.truncf %35 : vector<4x8x8xf32> to vector<4x8x8xbf16>
    "tpu.trace_start"() <{level = 10 : i32, message = "hqd,hkd->hqk"}> : () -> ()
    %cst_13 = arith.constant dense<0.000000e+00> : vector<4x8x8xf32>
    %37 = tpu.matmul %32, %34, %cst_13 {dimension_numbers = #tpu.dot_dimension_numbers<[2], [2], [1], [1], [0, 0, 0, 1, 1, 1], [0], [0]>} : vector<4x8x8xbf16>, vector<4x8x8xbf16>, vector<4x8x8xf32> -> vector<4x8x8xf32>
    "tpu.trace_stop"() : () -> ()
    %cst_14 = arith.constant 0.353553385 : f32
    %38 = vector.broadcast %cst_14 : f32 to vector<4x8x8xf32>
    %39 = arith.mulf %37, %38 : vector<4x8x8xf32>
    %cst_15 = arith.constant dense<0xFF800000> : vector<4x8xf32>
    %40 = vector.multi_reduction <maximumf>, %39, %cst_15 [2] : vector<4x8x8xf32> to vector<4x8xf32>
    %41 = vector.shape_cast %40 : vector<4x8xf32> to vector<4x8x1xf32>
    %42 = vector.broadcast %41 : vector<4x8x1xf32> to vector<4x8x8xf32>
    %43 = arith.subf %39, %42 : vector<4x8x8xf32>
    %44 = math.exp %43 : vector<4x8x8xf32>
    %cst_16 = arith.constant dense<0.000000e+00> : vector<4x8xf32>
    %45 = vector.multi_reduction <add>, %44, %cst_16 [2] : vector<4x8x8xf32> to vector<4x8xf32>
    %46 = vector.shape_cast %45 : vector<4x8xf32> to vector<4x8x1xf32>
    %47 = tpu.reciprocal %46 {approx = true} : vector<4x8x1xf32> -> vector<4x8x1xf32>
    %48 = vector.broadcast %47 : vector<4x8x1xf32> to vector<4x8x8xf32>
    %49 = arith.mulf %44, %48 : vector<4x8x8xf32>
    %50 = arith.truncf %49 : vector<4x8x8xf32> to vector<4x8x8xbf16>
    "tpu.trace_start"() <{level = 10 : i32, message = "hqk,hkd->hqd"}> : () -> ()
    %cst_17 = arith.constant dense<0.000000e+00> : vector<4x8x8xf32>
    %51 = tpu.matmul %50, %36, %cst_17 {dimension_numbers = #tpu.dot_dimension_numbers<[2], [1], [1], [2], [0, 0, 0, 1, 1, 2], [0], [0]>} : vector<4x8x8xbf16>, vector<4x8x8xbf16>, vector<4x8x8xf32> -> vector<4x8x8xf32>
    "tpu.trace_stop"() : () -> ()
    %52 = tpu.transpose %51, [1, 0, 2] : vector<4x8x8xf32> -> vector<8x4x8xf32>
    %53 = vector.shape_cast %52 : vector<8x4x8xf32> to vector<8x32xf32>
    %54 = arith.truncf %53 : vector<8x32xf32> to vector<8x32xbf16>
    %c0_18 = arith.constant 0 : index
    %c0_19 = arith.constant 0 : index
    %55 = vector.load %arg5[%c0_18, %c0_19] : memref<32x32xbf16, #tpu.memory_space<vmem>>, vector<32x32xbf16>
    %cst_20 = arith.constant dense<0.000000e+00> : vector<8x32xf32>
    %56 = tpu.matmul %54, %55, %cst_20 {dimension_numbers = #tpu.dot_dimension_numbers<[1], [0], [0], [1], [0, 0, 1, 1], [], []>} : vector<8x32xbf16>, vector<32x32xbf16>, vector<8x32xf32> -> vector<8x32xf32>
    %57 = arith.addf %1, %56 : vector<8x32xf32>
    %c0_21 = arith.constant 0 : index
    %c0_22 = arith.constant 0 : index
    %58 = vector.load %arg6[%c0_21, %c0_22] : memref<1x32xf32, #tpu.memory_space<vmem>>, vector<1x32xf32>
    %59 = vector.broadcast %58 : vector<1x32xf32> to vector<8x32xf32>
    %60 = arith.addf %57, %59 : vector<8x32xf32>
    %c0_23 = arith.constant 0 : index
    %c0_24 = arith.constant 0 : index
    %61 = vector.load %arg7[%c0_23, %c0_24] : memref<1x32xf32, #tpu.memory_space<vmem>>, vector<1x32xf32>
    %c0_25 = arith.constant 0 : index
    %c0_26 = arith.constant 0 : index
    %62 = vector.load %arg8[%c0_25, %c0_26] : memref<1x32xf32, #tpu.memory_space<vmem>>, vector<1x32xf32>
    %cst_27 = arith.constant dense<0.000000e+00> : vector<8xf32>
    %63 = vector.multi_reduction <add>, %60, %cst_27 [1] : vector<8x32xf32> to vector<8xf32>
    %64 = vector.shape_cast %63 : vector<8xf32> to vector<8x1xf32>
    %cst_28 = arith.constant 3.200000e+01 : f32
    %65 = vector.broadcast %cst_28 : f32 to vector<8x1xf32>
    %66 = arith.divf %64, %65 : vector<8x1xf32>
    %67 = vector.broadcast %66 : vector<8x1xf32> to vector<8x32xf32>
    %68 = arith.subf %60, %67 : vector<8x32xf32>
    %69 = arith.mulf %68, %68 : vector<8x32xf32>
    %cst_29 = arith.constant dense<0.000000e+00> : vector<8xf32>
    %70 = vector.multi_reduction <add>, %69, %cst_29 [1] : vector<8x32xf32> to vector<8xf32>
    %71 = vector.shape_cast %70 : vector<8xf32> to vector<8x1xf32>
    %cst_30 = arith.constant 3.200000e+01 : f32
    %72 = vector.broadcast %cst_30 : f32 to vector<8x1xf32>
    %73 = arith.divf %71, %72 : vector<8x1xf32>
    %74 = vector.broadcast %66 : vector<8x1xf32> to vector<8x32xf32>
    %75 = arith.subf %60, %74 : vector<8x32xf32>
    %cst_31 = arith.constant 9.99999974E-6 : f32
    %76 = vector.broadcast %cst_31 : f32 to vector<8x1xf32>
    %77 = arith.addf %73, %76 : vector<8x1xf32>
    %78 = math.rsqrt %77 : vector<8x1xf32>
    %79 = vector.broadcast %78 : vector<8x1xf32> to vector<8x32xf32>
    %80 = arith.mulf %75, %79 : vector<8x32xf32>
    %81 = vector.broadcast %61 : vector<1x32xf32> to vector<8x32xf32>
    %82 = arith.mulf %80, %81 : vector<8x32xf32>
    %83 = vector.broadcast %62 : vector<1x32xf32> to vector<8x32xf32>
    %84 = arith.addf %82, %83 : vector<8x32xf32>
    %85 = arith.truncf %84 : vector<8x32xf32> to vector<8x32xbf16>
    %c0_32 = arith.constant 0 : index
    %c0_33 = arith.constant 0 : index
    %86 = vector.load %arg9[%c0_32, %c0_33] : memref<32x128xbf16, #tpu.memory_space<vmem>>, vector<32x128xbf16>
    %cst_34 = arith.constant dense<0.000000e+00> : vector<8x128xf32>
    %87 = tpu.matmul %85, %86, %cst_34 {dimension_numbers = #tpu.dot_dimension_numbers<[1], [0], [0], [1], [0, 0, 1, 1], [], []>} : vector<8x32xbf16>, vector<32x128xbf16>, vector<8x128xf32> -> vector<8x128xf32>
    %c0_35 = arith.constant 0 : index
    %c0_36 = arith.constant 0 : index
    %88 = vector.load %arg10[%c0_35, %c0_36] : memref<1x128xf32, #tpu.memory_space<vmem>>, vector<1x128xf32>
    %89 = vector.broadcast %88 : vector<1x128xf32> to vector<8x128xf32>
    %90 = arith.addf %87, %89 : vector<8x128xf32>
    %cst_37 = arith.constant 5.000000e-01 : f32
    %91 = vector.broadcast %cst_37 : f32 to vector<8x128xf32>
    %92 = arith.mulf %91, %90 : vector<8x128xf32>
    %cst_38 = arith.constant 4.471500e-02 : f32
    %93 = vector.broadcast %cst_38 : f32 to vector<8x128xf32>
    %94 = arith.mulf %93, %90 : vector<8x128xf32>
    %95 = arith.mulf %94, %90 : vector<8x128xf32>
    %96 = arith.mulf %95, %90 : vector<8x128xf32>
    %97 = arith.addf %90, %96 : vector<8x128xf32>
    %cst_39 = arith.constant 0.797884583 : f32
    %98 = vector.broadcast %cst_39 : f32 to vector<8x128xf32>
    %99 = arith.mulf %98, %97 : vector<8x128xf32>
    %100 = math.tanh %99 : vector<8x128xf32>
    %cst_40 = arith.constant 1.000000e+00 : f32
    %101 = vector.broadcast %cst_40 : f32 to vector<8x128xf32>
    %102 = arith.addf %101, %100 : vector<8x128xf32>
    %103 = arith.mulf %92, %102 : vector<8x128xf32>
    %104 = arith.truncf %103 : vector<8x128xf32> to vector<8x128xbf16>
    %c0_41 = arith.constant 0 : index
    %c0_42 = arith.constant 0 : index
    %105 = vector.load %arg11[%c0_41, %c0_42] : memref<128x32xbf16, #tpu.memory_space<vmem>>, vector<128x32xbf16>
    %cst_43 = arith.constant dense<0.000000e+00> : vector<8x32xf32>
    %106 = tpu.matmul %104, %105, %cst_43 {dimension_numbers = #tpu.dot_dimension_numbers<[1], [0], [0], [1], [0, 0, 1, 1], [], []>} : vector<8x128xbf16>, vector<128x32xbf16>, vector<8x32xf32> -> vector<8x32xf32>
    %107 = arith.addf %60, %106 : vector<8x32xf32>
    %c0_44 = arith.constant 0 : index
    %c0_45 = arith.constant 0 : index
    %108 = vector.load %arg12[%c0_44, %c0_45] : memref<1x32xf32, #tpu.memory_space<vmem>>, vector<1x32xf32>
    %109 = vector.broadcast %108 : vector<1x32xf32> to vector<8x32xf32>
    %110 = arith.addf %107, %109 : vector<8x32xf32>
    %c0_46 = arith.constant 0 : index
    %c0_47 = arith.constant 0 : index
    %c0_48 = arith.constant 0 : index
    %111 = vector.load %arg13[%c0_46, %c0_47, %c0_48] : memref<1x8x32xf32, #tpu.memory_space<vmem>>, vector<1x8x32xf32>
    %112 = vector.shape_cast %111 : vector<1x8x32xf32> to vector<8x32xf32>
    %113 = vector.shape_cast %110 : vector<8x32xf32> to vector<1x8x32xf32>
    tpu.vector_store %arg13[%c0_46, %c0_47, %c0_48], %113 {strides = array<i32>} : memref<1x8x32xf32, #tpu.memory_space<vmem>>, vector<1x8x32xf32>,
    return
  }
  func.func @transform_0(%arg0: i32) -> (i32, i32, i32) {
    %c0_i32 = arith.constant 0 : i32
    %c0_i32_0 = arith.constant 0 : i32
    %c0_i32_1 = arith.constant 0 : i32
    return %arg0, %c0_i32, %c0_i32_0 : i32, i32, i32
  }
  func.func @transform_1(%arg0: i32) -> (i32, i32) {
    %c0_i32 = arith.constant 0 : i32
    %c0_i32_0 = arith.constant 0 : i32
    %c0_i32_1 = arith.constant 0 : i32
    return %c0_i32, %c0_i32_0 : i32, i32
  }
  func.func @transform_2(%arg0: i32) -> (i32, i32) {
    %c0_i32 = arith.constant 0 : i32
    %c0_i32_0 = arith.constant 0 : i32
    %c0_i32_1 = arith.constant 0 : i32
    return %c0_i32, %c0_i32_0 : i32, i32
  }
  func.func @transform_3(%arg0: i32) -> (i32, i32) {
    %c0_i32 = arith.constant 0 : i32
    %c0_i32_0 = arith.constant 0 : i32
    %c0_i32_1 = arith.constant 0 : i32
    return %c0_i32, %c0_i32_0 : i32, i32
  }
  func.func @transform_4(%arg0: i32) -> (i32, i32) {
    %c0_i32 = arith.constant 0 : i32
    %c0_i32_0 = arith.constant 0 : i32
    %c0_i32_1 = arith.constant 0 : i32
    return %c0_i32, %c0_i32_0 : i32, i32
  }
  func.func @transform_5(%arg0: i32) -> (i32, i32) {
    %c0_i32 = arith.constant 0 : i32
    %c0_i32_0 = arith.constant 0 : i32
    %c0_i32_1 = arith.constant 0 : i32
    return %c0_i32, %c0_i32_0 : i32, i32
  }
  func.func @transform_6(%arg0: i32) -> (i32, i32) {
    %c0_i32 = arith.constant 0 : i32
    %c0_i32_0 = arith.constant 0 : i32
    %c0_i32_1 = arith.constant 0 : i32
    return %c0_i32, %c0_i32_0 : i32, i32
  }
  func.func @transform_7(%arg0: i32) -> (i32, i32) {
    %c0_i32 = arith.constant 0 : i32
    %c0_i32_0 = arith.constant 0 : i32
    %c0_i32_1 = arith.constant 0 : i32
    return %c0_i32, %c0_i32_0 : i32, i32
  }
  func.func @transform_8(%arg0: i32) -> (i32, i32) {
    %c0_i32 = arith.constant 0 : i32
    %c0_i32_0 = arith.constant 0 : i32
    %c0_i32_1 = arith.constant 0 : i32
    return %c0_i32, %c0_i32_0 : i32, i32
  }
  func.func @transform_9(%arg0: i32) -> (i32, i32) {
    %c0_i32 = arith.constant 0 : i32
    %c0_i32_0 = arith.constant 0 : i32
    %c0_i32_1 = arith.constant 0 : i32
    return %c0_i32, %c0_i32_0 : i32, i32
  }
  func.func @transform_10(%arg0: i32) -> (i32, i32) {
    %c0_i32 = arith.constant 0 : i32
    %c0_i32_0 = arith.constant 0 : i32
    %c0_i32_1 = arith.constant 0 : i32
    return %c0_i32, %c0_i32_0 : i32, i32
  }
  func.func @transform_11(%arg0: i32) -> (i32, i32) {
    %c0_i32 = arith.constant 0 : i32
    %c0_i32_0 = arith.constant 0 : i32
    %c0_i32_1 = arith.constant 0 : i32
    return %c0_i32, %c0_i32_0 : i32, i32
  }
  func.func @transform_12(%arg0: i32) -> (i32, i32, i32) {
    %c0_i32 = arith.constant 0 : i32
    %c0_i32_0 = arith.constant 0 : i32
    %c0_i32_1 = arith.constant 0 : i32
    return %arg0, %c0_i32, %c0_i32_0 : i32, i32, i32
  }
}

</mosaic_0001>

<bundles_post_ra>
// kernel: tpu_custom_call.1
= control target key start
LH: loop header
LB: loop body
LE: loop exit
PB: predicated region body
PF: predicated region fallthrough
CT: control target
= control target key end

     0   :  { %s2662_s0 = inlined_call_operand.vmem [shape: f32[2,8,32], index: 0, kind: input, shape index: {}]   ;;  %s2663_s1 = inlined_call_operand.vmem [shape: f32[1,32], index: 1, kind: input, shape index: {}]   ;;  %s2664_s2 = inlined_call_operand.vmem [shape: f32[1,32], index: 2, kind: input, shape index: {}]   ;;  %s2665_s3 = inlined_call_operand.vmem [shape: bf16[32,96], index: 3, kind: input, shape index: {}]   ;;  %s2666_s4 = inlined_call_operand.vmem [shape: bf16[32,32], index: 4, kind: input, shape index: {}]   ;;  %s2667_s5 = inlined_call_operand.vmem [shape: f32[1,32], index: 5, kind: input, shape index: {}]   ;;  %s2668_s6 = inlined_call_operand.vmem [shape: f32[1,32], index: 6, kind: input, shape index: {}]   ;;  %s2669_s7 = inlined_call_operand.vmem [shape: f32[1,32], index: 7, kind: input, shape index: {}]   ;;  %s2670_s8 = inlined_call_operand.vmem [shape: bf16[32,128], index: 8, kind: input, shape index: {}]   ;;  %s2671_s9 = inlined_call_operand.vmem [shape: f32[1,128], index: 9, kind: input, shape index: {}]   ;;  %s2672_s10 = inlined_call_operand.vmem [shape: bf16[128,32], index: 10, kind: input, shape index: {}]   ;;  %s2673_s11 = inlined_call_operand.vmem [shape: f32[1,32], index: 11, kind: input, shape index: {}]   ;;  %s2674_s12 = inlined_call_operand.hbm [shape: f32[2,8,32], index: 12, kind: output, shape index: {}]  }
   0x1   :  { %2675 = sst [smem:[#allocation5_spill]] %s2662_s0 }
   0x2   :  { %2676 = sst [smem:[#allocation6_spill]] %s2663_s1 }
   0x3   :  { %17 = vsyncpa [#allocation3], 0 }
   0x4   :  { %19 = vsyncpa [#allocation3 + $0x1], 0  ;;  %s2312_s21 = smov 0   ;;  %s2314_s22 = smov 0  }
   0x5   :  { %s2316_s23 = smov 0   ;;  %s2318_s24 = smov 0  }
   0x6 LB: > { %s2333_s25 = sadd.s32 4294967295, %s2226_s24   ;;  %s1893_s26 = sadd.s32 4294967294, %s2226_s24   ;;  %s2226_s24 = sphi %s2318_s24, %s2684_s24   ;;  %s2222_s23 = sphi %s2316_s23, %s2683_s23   ;;  %s2218_s22 = sphi %s2314_s22, %s2682_s22   ;;  %s2214_s21 = sphi %s2312_s21, %s2681_s21  }
   0x7   : > { %s2337_s27 = sadd.s32 1, %s2226_s24   ;;  %s289_s28 = sadd.s32 1, %s2222_s23 }
   0x8   : > { %s286_s29 = ssub.s32 %s2226_s24, %s2337_s27  ;;  %p299_p0 = scmp.ne.s32.totalorder %s2222_s23, %s2218_s22 }
   0x9   : > { %p287_p1 = scmp.eq.s32.totalorder %s286_s29, 0  ;;  %p300_p2 = scmp.eq.s32.totalorder %s2333_s25, 1 }
   0xa   : > { %p305_p3 = scmp.ne.s32.totalorder %s2218_s22, %s2214_s21  ;;  %p306_p4 = scmp.eq.s32.totalorder %s1893_s26, 1 }
   0xb   : > { %s2348_s30 = scalar_select %p287_p1, %s2222_s23, %s289_s28  }
   0xc   : > { %p2350_p5 = por %p300_p2, %p299_p0  ;;  %p2354_p6 = por %p306_p4, %p305_p3 }
   0xd   : > { %p1896_p7 = scmp.ge.s32.totalorder %s2226_s24, 1  ;;  %p364_p8 = scmp.lt.s32.totalorder %s2226_s24, 3 }
   0xf   : > { %p365_p9 = pnand %p1896_p7, %p364_p8 }
  0x10   : > { %p405_p10 = scmp.lt.s32.totalorder (!%p365_p9), %s2333_s25, 1  ;;  %s2679_s0 = sld [smem:[#allocation5_spill]] (!%p365_p9) }
  0x11   : > { %368 = sbr.rel (%p365_p9) target bundleno = 2531 (0x9e3), region = 68  ;;  %s2680_s1 = sld [smem:[#allocation6_spill]] (!%p365_p9) }
  0x12   : > { %s2231_s20 = smov (!%p365_p9), 96   ;;  %s2232_s26 = smov (!%p365_p9), 88  }
  0x13   : > { %s2233_s28 = smov (!%p365_p9), 72   ;;  %s2234_s29 = smov (!%p365_p9), 120  }
  0x14   : > { %s2239_s17 = smov (!%p365_p9), 64   ;;  %s2240_s18 = smov (!%p365_p9), 48  }
  0x16   : > { %s406_s15 = scalar_select %p405_p10, %s2333_s25, 1  ;;  %vm413_vm0 = vcmask 261120   ;;  %v2130_v7 = vld [vmem:[%s2665_s3 + $0x8] sm:$0xff]   ;;  %v2228_v8 = vmov 0.0   ;;  %vm2229_vm1 = vmmov 0   ;;  %v2131_v9 = vld [vmem:[%s2665_s3] sm:$0xff]   ;;  %v541_v26 = vlaneseq }
  0x17   : > { %1981 = vmatprep.subr.bf16.mxu0 %v2228_v8  ;;  %1985 = vmatprep.mubr.msk.bf16.mxu0 %vm2229_vm1, %v2228_v8  ;;  %v1899_v14 = vld [vmem:[%s2680_s1] ss:$0 sm:$0xff]  ;;  %v2237_v24 = vmov 1983009808   ;;  %v2238_v28 = vmov 1934713408  }
  0x18   : > { %s1898_s16 = sshll.u32 %s406_s15, 3  ;;  %1982 = vmatpush3.bf16.msra.mxu0 %v2130_v7  ;;  %2001 = vmatprep.subr.bf16.mxu1 %v2228_v8  ;;  %v1900_v16 = vld [vmem:[%s2664_s2] ss:$0 sm:$0xff]  ;;  %s2235_s15 = smov 112   ;;  %v539_v25 = vunpack.c.l.s4 %v2237_v24  ;;  %v603_v29 = vunpack.c.l.s4 %v2238_v28  ;;  %v542_v31 = vshrl.u32 %v541_v26, 7  ;;  %vm956_vm2 = vcmask 64512  }
  0x19   : > { %s408_s19 = scalar_lea.vmem %s2679_s0, %s1898_s16  ;;  %1983 = vmatprep.subr.bf16.mxu0 %v2228_v8  ;;  %2003 = vmatprep.mubr.msk.bf16.mxu1 %vm2229_vm1, %v2228_v8  ;;  %s2236_s16 = smov 104   ;;  %vm1196_vm3 = vcmask 1043456   ;;  %vm1527_vm4 = vcmask 130048   ;;  %vm1529_vm5 = vcmask 195584  }
  0x1a   : > { %v2365_v0 = vld [vmem:[%s408_s19] sm:$0xff]  ;;  %s2230_s19 = smov 80   ;;  %v540_v30 = vunpack.c.0.s8 %v539_v25  ;;  %v604_v34 = vunpack.c.0.s8 %v603_v29 }
  0x1b   : > { %v414_v1 = vsel %vm413_vm0, %v2365_v0, 0.0 }
  0x1c   : > { %415 = vadd.xlane.f32.xlu0 %v414_v1  ;;  %1984 = vmatpush3.bf16.msra.mxu0 %v2131_v9  ;;  %v2403_v35 = vsub.s32 %v540_v30, %v542_v31  ;;  %v2405_v41 = vsub.s32 %v604_v34, %v542_v31 }
  0x1d   : > { %1989 = vmatprep.subr.bf16.mxu0 %v2228_v8 }
  0xa5   : > { %v416_v2 = vpop.xlane.xlu0 %415 }
  0xa6   : > { %v418_v3 = vmul.f32 0.03125, %v416_v2 }
  0xa8   : > { %v419_v4 = vsub.f32 %v2365_v0, %v418_v3 }
  0xaa   : > { %v420_v5 = vmul.f32 %v419_v4, %v419_v4 }
  0xac   : > { %v421_v6 = vsel %vm413_vm0, %v420_v5, 0.0 }
  0xad   : > { %422 = vadd.xlane.f32.xlu0 %v421_v6 }
 0x136   : > { %v423_v10 = vpop.xlane.xlu0 %422 }
 0x137   : > { %v424_v11 = vmul.f32 0.03125, %v423_v10 }
 0x139   : > { %v425_v12 = vadd.f32 1e-05, %v424_v11 }
 0x13b   : > { %2144 = vrsqrt.f32 %v425_v12 }
 0x148   : > { %v2145_v13 = vpop.eup %2144 }
 0x149   : > { %v427_v15 = vmul.f32 %v2145_v13, %v419_v4 }
 0x14b   : > { %v434_v17 = vmul.f32 %v1899_v14, %v427_v15 }
 0x14d   : > { %v441_v18 = vadd.f32 %v1900_v16, %v434_v17 }
 0x14f   : > { %v442_v19 = vpack.c.bf16 %v441_v18, %v441_v18 }
 0x151   : > { %1986 = vmatmul.mubr.msk.bf16.vlgmr.msra.gmra.mxu0 %vm413_vm0, %v442_v19 }
 0x152   : > { %1991 = vmatprep.mubr.msk.bf16.mxu0 %vm2229_vm1, %v2228_v8 }
 0x211   : > { %v2394_v20 = vpop.f32.mrf.mxu0 }
 0x212   : > { %518 = vrot.lane.b32.xlu0 %v2394_v20, %s2230_s19  ;;  %512 = vrot.lane.b32.xlu1 %v2394_v20, %s2231_s20  ;;  %s2241_s19 = smov 40   ;;  %s2242_s20 = smov 56  }
 0x213   : > { %v1987_v21 = vpop.f32.mrf.mxu0 }
 0x215   : > { %v499_v22 = vpop.f32.mrf.mxu0 }
 0x216   : > { %515 = vrot.lane.b32.xlu1 %v2394_v20, %s2232_s26 }
 0x217   : > { %v1988_v23 = vpop.f32.mrf.mxu0 }
 0x21a   : > { %521 = vrot.lane.b32.xlu1 %v2394_v20, %s2233_s28  ;;  %s2246_s28 = smov [#allocation2]  }
 0x21e   : > { %503 = vrot.lane.b32.xlu1 %v2394_v20, %s2234_s29  ;;  %s2170_s29 = sshll.u32 %s2246_s28, 4  ;;  %s2171_s29 = int_to_ptr.vmem [resolvable:$false] %s2170_s29 }
 0x222   : > { %506 = vrot.lane.b32.xlu1 %v2394_v20, %s2235_s15  ;;  %s1944_s15 = sshll.u32 %s2333_s25, 7 }
 0x223   : > { %s2620_s0 = scalar_lea.hbm %s2674_s12, %s1944_s15  ;;  %s2172_s15 = scalar_lea.vmem %s2171_s29, 256 }
 0x226   : > { %509 = vrot.lane.b32.xlu1 %v2394_v20, %s2236_s16  ;;  %s2243_s16 = smov 16  }
 0x284   : > { %v513_v27 = vpop.permute.xlu1 %512  ;;  %v519_v32 = vpop.permute.xlu0 %518 }
 0x285   : > { %v568_v36 = vcombine.low %v513_v27, %v519_v32  ;;  %v569_v37 = vcombine.high %v513_v27, %v519_v32 }
 0x287   : > { %v576_v42 = vrot.slane %v568_v36, %v2403_v35  ;;  %v583_v43 = vrot.slane %v569_v37, %v2403_v35 }
 0x288   : > { %v516_v33 = vpop.permute.xlu1 %515 }
 0x28c   : > { %v522_v38 = vpop.permute.xlu1 %521 }
 0x28d   : > { %v584_v39 = vcombine.low %v516_v33, %v522_v38  ;;  %v585_v40 = vcombine.high %v516_v33, %v522_v38 }
 0x28f   : > { %v592_v44 = vrot.slane %v584_v39, %v2403_v35  ;;  %v599_v45 = vrot.slane %v585_v40, %v2403_v35 }
 0x290   : > { %v504_v46 = vpop.permute.xlu1 %503 }
 0x291   : > { %v632_v47 = vcombine.low %v576_v42, %v592_v44  ;;  %v633_v48 = vcombine.high %v576_v42, %v592_v44  ;;  %v648_v49 = vcombine.low %v583_v43, %v599_v45  ;;  %v649_v50 = vcombine.high %v583_v43, %v599_v45 }
 0x293   : > { %v640_v51 = vrot.slane %v632_v47, %v2405_v41  ;;  %v647_v52 = vrot.slane %v633_v48, %v2405_v41  ;;  %v656_v53 = vrot.slane %v648_v49, %v2405_v41  ;;  %v663_v54 = vrot.slane %v649_v50, %v2405_v41 }
 0x294   : > { %v507_v55 = vpop.permute.xlu1 %506 }
 0x295   : > { %v1905_v56 = vcombine.low %v640_v51, %v647_v52  ;;  %v1907_v57 = vcombine.high %v640_v51, %v647_v52  ;;  %v1909_v58 = vcombine.low %v656_v53, %v663_v54  ;;  %v1911_v59 = vcombine.high %v656_v53, %v663_v54 }
 0x296   : > { %v536_v60 = vcombine.low %v2394_v20, %v507_v55  ;;  %v537_v61 = vcombine.high %v2394_v20, %v507_v55 }
 0x297   : > { %v755_v62 = vrot.slane %v1905_v56, %v2403_v35  ;;  %v771_v63 = vrot.slane %v1907_v57, %v2403_v35  ;;  %v787_v1 = vrot.slane %v1909_v58, %v2403_v35  ;;  %v803_v2 = vrot.slane %v1911_v59, %v2403_v35 }
 0x298   : > { %v510_v3 = vpop.permute.xlu1 %509  ;;  %v544_v9 = vrot.slane %v536_v60, %v2403_v35  ;;  %v551_v10 = vrot.slane %v537_v61, %v2403_v35 }
 0x299   : > { %v552_v4 = vcombine.low %v504_v46, %v510_v3  ;;  %v553_v5 = vcombine.high %v504_v46, %v510_v3  ;;  %v820_v6 = vcombine.low %v755_v62, %v771_v63  ;;  %v852_v7 = vcombine.low %v787_v1, %v803_v2 }
 0x29a   : > { %v821_v11 = vcombine.high %v755_v62, %v771_v63  ;;  %v853_v12 = vcombine.high %v787_v1, %v803_v2 }
 0x29b   : > { %v560_v13 = vrot.slane %v552_v4, %v2403_v35  ;;  %v567_v14 = vrot.slane %v553_v5, %v2403_v35  ;;  %v828_v15 = vrot.slane %v820_v6, %v2405_v41  ;;  %v860_v16 = vrot.slane %v852_v7, %v2405_v41 }
 0x29c   : > { %v835_v17 = vrot.slane %v821_v11, %v2405_v41  ;;  %v867_v18 = vrot.slane %v853_v12, %v2405_v41 }
 0x29d   : > { %v600_v19 = vcombine.low %v544_v9, %v560_v13  ;;  %v601_v21 = vcombine.high %v544_v9, %v560_v13  ;;  %v616_v22 = vcombine.low %v551_v10, %v567_v14  ;;  %v617_v23 = vcombine.high %v551_v10, %v567_v14 }
 0x29e   : > { %v872_v24 = vcombine.low %v828_v15, %v860_v16  ;;  %v874_v25 = vcombine.low %v835_v17, %v867_v18  ;;  %v873_v44 = vcombine.high %v828_v15, %v860_v16  ;;  %v875_v59 = vcombine.high %v835_v17, %v867_v18 }
 0x29f   : > { %v608_v26 = vrot.slane %v600_v19, %v2405_v41  ;;  %v615_v27 = vrot.slane %v601_v21, %v2405_v41  ;;  %v624_v28 = vrot.slane %v616_v22, %v2405_v41  ;;  %v631_v29 = vrot.slane %v617_v23, %v2405_v41 }
 0x2a0   : > { %v948_v30 = vpack.c.bf16 %v872_v24, %v872_v24  ;;  %v950_v31 = vpack.c.bf16 %v874_v25, %v874_v25  ;;  %v949_v54 = vpack.c.bf16 %v873_v44, %v873_v44  ;;  %v951_v61 = vpack.c.bf16 %v875_v59, %v875_v59 }
 0x2a1   : > { %v1904_v32 = vcombine.low %v608_v26, %v615_v27  ;;  %v1906_v33 = vcombine.high %v608_v26, %v615_v27  ;;  %v1908_v34 = vcombine.low %v624_v28, %v631_v29  ;;  %v1910_v36 = vcombine.high %v624_v28, %v631_v29 }
 0x2a2   : > { %v961_v37 = vsel %vm956_vm2, %v948_v30, 0  ;;  %v1053_v38 = vsel %vm956_vm2, %v950_v31, 0  ;;  %v1007_v58 = vsel %vm956_vm2, %v949_v54, 0  ;;  %v1099_v63 = vsel %vm956_vm2, %v951_v61, 0 }
 0x2a3   : > { %v748_v39 = vrot.slane %v1904_v32, %v2403_v35  ;;  %v764_v40 = vrot.slane %v1906_v33, %v2403_v35  ;;  %v780_v42 = vrot.slane %v1908_v34, %v2403_v35  ;;  %v796_v43 = vrot.slane %v1910_v36, %v2403_v35  ;;  %1990 = vmatpush3.bf16.xpose.msra.mxu0 %v961_v37 }
 0x2a4   : > { %2002 = vmatpush3.bf16.xpose.msra.mxu1 %v1053_v38  ;;  %1995 = vmatprep.subr.bf16.mxu0 %v2228_v8 }
 0x2a5   : > { %v804_v45 = vcombine.low %v748_v39, %v764_v40  ;;  %v836_v46 = vcombine.low %v780_v42, %v796_v43  ;;  %v805_v47 = vcombine.high %v748_v39, %v764_v40  ;;  %v837_v48 = vcombine.high %v780_v42, %v796_v43  ;;  %2013 = vmatprep.subr.bf16.mxu1 %v2228_v8 }
 0x2a7   : > { %v812_v49 = vrot.slane %v804_v45, %v2405_v41  ;;  %v844_v50 = vrot.slane %v836_v46, %v2405_v41  ;;  %v819_v51 = vrot.slane %v805_v47, %v2405_v41  ;;  %v851_v52 = vrot.slane %v837_v48, %v2405_v41 }
 0x2a9   : > { %v868_v53 = vcombine.low %v812_v49, %v844_v50  ;;  %v870_v55 = vcombine.low %v819_v51, %v851_v52  ;;  %v869_v60 = vcombine.high %v812_v49, %v844_v50  ;;  %v871_v1 = vcombine.high %v819_v51, %v851_v52 }
 0x2ab   : > { %v944_v56 = vpack.c.bf16 %v868_v53, %v868_v53  ;;  %v946_v57 = vpack.c.bf16 %v870_v55, %v870_v55  ;;  %v945_v62 = vpack.c.bf16 %v869_v60, %v869_v60  ;;  %v947_v2 = vpack.c.bf16 %v871_v1, %v871_v1 }
 0x2ad   : > { %1992 = vmatmul.mubr.msk.bf16.vlgmr.msra.gmra.mxu0 %vm956_vm2, %v944_v56  ;;  %2004 = vmatmul.mubr.msk.bf16.vlgmr.msra.gmra.mxu1 %vm956_vm2, %v946_v57 }
 0x2ae   : > { %1996 = vmatpush3.bf16.xpose.msra.mxu0 %v1007_v58  ;;  %1997 = vmatprep.mubr.msk.bf16.mxu0 %vm2229_vm1, %v2228_v8 }
 0x2af   : > { %2007 = vmatprep.subr.bf16.mxu0 %v2228_v8  ;;  %2015 = vmatprep.mubr.msk.bf16.mxu1 %vm2229_vm1, %v2228_v8 }
 0x2b5   : > { %1998 = vmatmul.mubr.msk.bf16.vlgmr.msra.gmra.mxu0 %vm956_vm2, %v945_v62 }
 0x2b6   : > { %2008 = vmatpush3.bf16.xpose.msra.mxu0 %v1099_v63  ;;  %2009 = vmatprep.mubr.msk.bf16.mxu0 %vm2229_vm1, %v2228_v8 }
 0x2b7   : > { %2019 = vmatprep.subr.bf16.mxu0 %v2228_v8 }
 0x2bd   : > { %2010 = vmatmul.mubr.msk.bf16.vlgmr.msra.gmra.mxu0 %vm956_vm2, %v947_v2 }
 0x2be   : > { %2021 = vmatprep.mubr.msk.bf16.mxu0 %vm2229_vm1, %v2228_v8 }
 0x36d   : > { %v997_v3 = vpop.f32.mrf.mxu0  ;;  %v1089_v4 = vpop.f32.mrf.mxu1 }
 0x36e   : > { %v1141_v5 = vmul.f32 0.35355338, %v997_v3  ;;  %v1143_v9 = vmul.f32 0.35355338, %v1089_v4 }
 0x36f   : > { %v1993_v6 = vpop.f32.mrf.mxu0  ;;  %v2005_v7 = vpop.f32.mrf.mxu1 }
 0x370   : > { %v1145_v10 = vsel %vm956_vm2, %v1141_v5, -inf  ;;  %v1151_v15 = vsel %vm956_vm2, %v1143_v9, -inf }
 0x371   : > { %v1092_v11 = vpop.f32.mrf.mxu1  ;;  %1146 = vmax.xlane.f32.xlu1 %v1145_v10  ;;  %v1000_v12 = vpop.f32.mrf.mxu0 }
 0x373   : > { %v1994_v13 = vpop.f32.mrf.mxu0  ;;  %v2006_v14 = vpop.f32.mrf.mxu1 }
 0x375   : > { %1152 = vmax.xlane.f32.xlu1 %v1151_v15  ;;  %v1043_v16 = vpop.f32.mrf.mxu0 }
 0x376   : > { %v1142_v17 = vmul.f32 0.35355338, %v1043_v16 }
 0x377   : > { %v1999_v18 = vpop.f32.mrf.mxu0 }
 0x378   : > { %v1148_v19 = vsel %vm956_vm2, %v1142_v17, -inf }
 0x379   : > { %1149 = vmax.xlane.f32.xlu0 %v1148_v19  ;;  %v1046_v21 = vpop.f32.mrf.mxu0 }
 0x37b   : > { %v2000_v22 = vpop.f32.mrf.mxu0 }
 0x37d   : > { %v1135_v23 = vpop.f32.mrf.mxu0 }
 0x37e   : > { %v1144_v24 = vmul.f32 0.35355338, %v1135_v23 }
 0x37f   : > { %v2011_v25 = vpop.f32.mrf.mxu0 }
 0x380   : > { %v1154_v26 = vsel %vm956_vm2, %v1144_v24, -inf }
 0x381   : > { %1155 = vmax.xlane.f32.xlu0 %v1154_v26  ;;  %v1138_v27 = vpop.f32.mrf.mxu0 }
 0x383   : > { %v2012_v28 = vpop.f32.mrf.mxu0 }
 0x386   : > { %524 = vrot.lane.b32.xlu1 %v2394_v20, %s2239_s17  ;;  %s2244_s17 = smov 8  }
 0x3fa   : > { %v1147_v29 = vpop.xlane.xlu1 %1146 }
 0x3fb   : > { %v1157_v30 = vsub.f32 %v1141_v5, %v1147_v29 }
 0x3fd   : > { %v1161_v31 = vmul.f32 1.442695, %v1157_v30 }
 0x3fe   : > { %v1153_v43 = vpop.xlane.xlu1 %1152 }
 0x3ff   : > { %2146 = vpow2.f32 %v1161_v31  ;;  %v1159_v44 = vsub.f32 %v1143_v9, %v1153_v43 }
 0x401   : > { %v1165_v46 = vmul.f32 1.442695, %v1159_v44 }
 0x402   : > { %v1150_v32 = vpop.xlane.xlu0 %1149 }
 0x403   : > { %v1158_v33 = vsub.f32 %v1142_v17, %v1150_v32 }
 0x405   : > { %v1163_v34 = vmul.f32 1.442695, %v1158_v33 }
 0x407   : > { %2148 = vpow2.f32 %v1163_v34 }
 0x40a   : > { %v1156_v40 = vpop.xlane.xlu0 %1155 }
 0x40b   : > { %v1160_v42 = vsub.f32 %v1144_v24, %v1156_v40 }
 0x40c   : > { %v2466_v36 = vpop.eup %2146 }
 0x40d   : > { %v1169_v37 = vsel %vm956_vm2, %v2466_v36, 0.0  ;;  %v1167_v45 = vmul.f32 1.442695, %v1160_v42 }
 0x40e   : > { %1170 = vadd.xlane.f32.xlu1 %v1169_v37 }
 0x40f   : > { %2150 = vpow2.f32 %v1167_v45 }
 0x410   : > { %2152 = vpow2.f32 %v1165_v46 }
 0x414   : > { %v2470_v38 = vpop.eup %2148 }
 0x415   : > { %v1172_v39 = vsel %vm956_vm2, %v2470_v38, 0.0 }
 0x416   : > { %1173 = vadd.xlane.f32.xlu0 %v1172_v39 }
 0x41c   : > { %v2477_v47 = vpop.eup %2150 }
 0x41d   : > { %v1178_v48 = vsel %vm956_vm2, %v2477_v47, 0.0  ;;  %v2481_v49 = vpop.eup %2152 }
 0x41e   : > { %v1175_v50 = vsel %vm956_vm2, %v2481_v49, 0.0 }
 0x41f   : > { %530 = vrot.lane.b32.xlu1 %v2394_v20, %s2240_s18  ;;  %s2245_s18 = smov 24  }
 0x423   : > { %533 = vrot.lane.b32.xlu1 %v2394_v20, %s2241_s19 }
 0x42c   : > { %527 = vrot.lane.b32.xlu0 %v2394_v20, %s2242_s20  ;;  %v525_v20 = vpop.permute.xlu1 %524  ;;  %s402_s20 = sand.u32 1, %s2218_s22  }
 0x42d   : > { %s1897_s26 = sshll.u32 %s402_s20, 3  ;;  %s1821_s25 = scalar_lea.sflag [#allocation3], %s402_s20 }
 0x447   : > { %1179 = vadd.xlane.f32.xlu1 %v1178_v48 }
 0x44b   : > { %1176 = vadd.xlane.f32.xlu0 %v1175_v50 }
 0x497   : > { %v1171_v51 = vpop.xlane.xlu1 %1170 }
 0x498   : > { %2154 = vrcp.f32 %v1171_v51 }
 0x49b   : > { %v531_v52 = vpop.permute.xlu1 %530 }
 0x49c   : > { %v672_v54 = vcombine.low %v525_v20, %v531_v52  ;;  %v673_v55 = vcombine.high %v525_v20, %v531_v52 }
 0x49e   : > { %v680_v60 = vrot.slane %v672_v54, %v2403_v35  ;;  %v687_v61 = vrot.slane %v673_v55, %v2403_v35 }
 0x49f   : > { %v1174_v53 = vpop.xlane.xlu0 %1173  ;;  %v534_v56 = vpop.permute.xlu1 %533 }
 0x4a0   : > { %2156 = vrcp.f32 %v1174_v53 }
 0x4a3   : > { %v528_v57 = vpop.permute.xlu0 %527 }
 0x4a4   : > { %v688_v58 = vcombine.low %v528_v57, %v534_v56  ;;  %v689_v59 = vcombine.high %v528_v57, %v534_v56  ;;  %v2132_v56 = vld [vmem:[%s2666_s4 + $0x8] sm:$0xff]  }
 0x4a5   : > { %v2155_v23 = vpop.eup %2154 }
 0x4a6   : > { %v696_v62 = vrot.slane %v688_v58, %v2403_v35  ;;  %v703_v63 = vrot.slane %v689_v59, %v2403_v35  ;;  %v1185_v37 = vmul.f32 %v2155_v23, %v2466_v36 }
 0x4a8   : > { %v704_v1 = vcombine.low %v680_v60, %v696_v62  ;;  %v705_v2 = vcombine.high %v680_v60, %v696_v62  ;;  %v720_v3 = vcombine.low %v687_v61, %v703_v63  ;;  %v721_v4 = vcombine.high %v687_v61, %v703_v63 }
 0x4a9   : > { %v1189_v45 = vpack.c.bf16 %v1185_v37, %v1185_v37 }
 0x4aa   : > { %v712_v5 = vrot.slane %v704_v1, %v2405_v41  ;;  %v719_v6 = vrot.slane %v705_v2, %v2405_v41  ;;  %v728_v7 = vrot.slane %v720_v3, %v2405_v41  ;;  %v735_v9 = vrot.slane %v721_v4, %v2405_v41 }
 0x4ac   : > { %v876_v10 = vcombine.low %v712_v5, %v719_v6  ;;  %v1912_v11 = vcombine.high %v712_v5, %v719_v6  ;;  %v892_v12 = vcombine.low %v728_v7, %v735_v9  ;;  %v1913_v13 = vcombine.high %v728_v7, %v735_v9 }
 0x4ad   : > { %v2157_v28 = vpop.eup %2156 }
 0x4ae   : > { %v883_v14 = vrot.slane %v876_v10, %v2403_v35  ;;  %v891_v15 = vrot.slane %v1912_v11, %v2403_v35  ;;  %v899_v16 = vrot.slane %v892_v12, %v2403_v35  ;;  %v907_v17 = vrot.slane %v1913_v13, %v2403_v35 }
 0x4af   : > { %v1186_v39 = vmul.f32 %v2157_v28, %v2470_v38 }
 0x4b0   : > { %v908_v18 = vcombine.low %v883_v14, %v891_v15  ;;  %v924_v19 = vcombine.low %v899_v16, %v907_v17  ;;  %v909_v21 = vcombine.high %v883_v14, %v891_v15  ;;  %v925_v22 = vcombine.high %v899_v16, %v907_v17 }
 0x4b1   : > { %v1190_v46 = vpack.c.bf16 %v1186_v39, %v1186_v39 }
 0x4b2   : > { %v916_v24 = vrot.slane %v908_v18, %v2405_v41  ;;  %v932_v25 = vrot.slane %v924_v19, %v2405_v41  ;;  %v923_v26 = vrot.slane %v909_v21, %v2405_v41  ;;  %v939_v27 = vrot.slane %v925_v22, %v2405_v41  ;;  %v2133_v22 = vld [vmem:[%s2666_s4] sm:$0xff]  }
 0x4b4   : > { %v940_v29 = vcombine.low %v916_v24, %v932_v25  ;;  %v941_v30 = vcombine.high %v916_v24, %v932_v25  ;;  %v942_v31 = vcombine.low %v923_v26, %v939_v27  ;;  %v943_v32 = vcombine.high %v923_v26, %v939_v27 }
 0x4b6   : > { %v952_v33 = vpack.c.bf16 %v940_v29, %v940_v29  ;;  %v953_v34 = vpack.c.bf16 %v941_v30, %v941_v30  ;;  %v954_v43 = vpack.c.bf16 %v942_v31, %v942_v31  ;;  %v955_v44 = vpack.c.bf16 %v943_v32, %v943_v32 }
 0x4b8   : > { %v1198_v40 = vsel %vm1196_vm3, %v952_v33, 0  ;;  %v1244_v42 = vsel %vm1196_vm3, %v953_v34, 0  ;;  %v1290_v36 = vsel %vm1196_vm3, %v954_v43, 0  ;;  %v1336_v38 = vsel %vm1196_vm3, %v955_v44, 0 }
 0x4b9   : > { %2014 = vmatpush3.bf16.msra.mxu1 %v1198_v40  ;;  %2020 = vmatpush3.bf16.msra.mxu0 %v1244_v42 }
 0x4ba   : > { %2025 = vmatprep.subr.bf16.mxu1 %v2228_v8  ;;  %2031 = vmatprep.subr.bf16.mxu0 %v2228_v8 }
 0x4bc   : > { %2016 = vmatmul.mubr.msk.bf16.vlgmr.msra.gmra.mxu1 %vm956_vm2, %v1189_v45  ;;  %2022 = vmatmul.mubr.msk.bf16.vlgmr.msra.gmra.mxu0 %vm956_vm2, %v1190_v46 }
 0x4bd   : > { %2026 = vmatpush3.bf16.msra.mxu1 %v1290_v36  ;;  %2032 = vmatpush3.bf16.msra.mxu0 %v1336_v38 }
 0x4be   : > { %2033 = vmatprep.mubr.msk.bf16.mxu0 %vm2229_vm1, %v2228_v8  ;;  %2027 = vmatprep.mubr.msk.bf16.mxu1 %vm2229_vm1, %v2228_v8 }
 0x4bf   : > { %2037 = vmatprep.subr.bf16.mxu1 %v2228_v8  ;;  %2045 = vmatprep.subr.bf16.mxu0 %v2228_v8 }
 0x4d0   : > { %v1180_v48 = vpop.xlane.xlu1 %1179 }
 0x4d1   : > { %2158 = vrcp.f32 %v1180_v48 }
 0x4d4   : > { %v1177_v50 = vpop.xlane.xlu0 %1176 }
 0x4d5   : > { %2160 = vrcp.f32 %v1177_v50 }
 0x4de   : > { %v2159_v20 = vpop.eup %2158 }
 0x4df   : > { %v1188_v51 = vmul.f32 %v2159_v20, %v2477_v47 }
 0x4e1   : > { %v1192_v52 = vpack.c.bf16 %v1188_v51, %v1188_v51 }
 0x4e2   : > { %v2161_v53 = vpop.eup %2160 }
 0x4e3   : > { %2034 = vmatmul.mubr.msk.bf16.vlgmr.msra.gmra.mxu0 %vm956_vm2, %v1192_v52  ;;  %v1187_v54 = vmul.f32 %v2161_v53, %v2481_v49 }
 0x4e4   : > { %2049 = vmatprep.mubr.msk.bf16.mxu0 %vm2229_vm1, %v2228_v8 }
 0x4e5   : > { %v1191_v55 = vpack.c.bf16 %v1187_v54, %v1187_v54 }
 0x4e7   : > { %2028 = vmatmul.mubr.msk.bf16.vlgmr.msra.gmra.mxu1 %vm956_vm2, %v1191_v55 }
 0x4e8   : > { %2041 = vmatprep.mubr.msk.bf16.mxu1 %vm2229_vm1, %v2228_v8  ;;  %2038 = vmatpush3.bf16.msra.mxu1 %v2132_v56  ;;  %v1927_v56 = vld [vmem:[%s2667_s5] ss:$0 sm:$0xff] }
 0x4e9   : > { %2039 = vmatprep.subr.bf16.mxu1 %v2228_v8 }
 0x4ec   : > { %2040 = vmatpush3.bf16.msra.mxu1 %v2133_v22  ;;  %v2142_v22 = vld [vmem:[%s2672_s10 + $0x8] sm:$0xff]  }
 0x4ed   : > { %2053 = vmatprep.subr.bf16.mxu1 %v2228_v8 }
 0x57c   : > { %v1234_v47 = vpop.f32.mrf.mxu1  ;;  %v1280_v57 = vpop.f32.mrf.mxu0 }
 0x57e   : > { %v2017_v58 = vpop.f32.mrf.mxu1  ;;  %v2023_v49 = vpop.f32.mrf.mxu0 }
 0x580   : > { %v1237_v59 = vpop.f32.mrf.mxu1  ;;  %v1283_v60 = vpop.f32.mrf.mxu0 }
 0x582   : > { %v2018_v61 = vpop.f32.mrf.mxu1  ;;  %v2024_v62 = vpop.f32.mrf.mxu0 }
 0x5a3   : > { %v1372_v63 = vpop.f32.mrf.mxu0 }
 0x5a4   : > { %v1394_v2 = vcombine.low %v1280_v57, %v1372_v63  ;;  %v1395_v3 = vcombine.high %v1280_v57, %v1372_v63 }
 0x5a5   : > { %v2035_v1 = vpop.f32.mrf.mxu0 }
 0x5a6   : > { %v1402_v11 = vrot.slane %v1394_v2, %v2403_v35  ;;  %v1409_v12 = vrot.slane %v1395_v3, %v2403_v35  ;;  %v2135_v3 = vld [vmem:[%s2670_s8] sm:$0xff]  }
 0x5a7   : > { %v1326_v4 = vpop.f32.mrf.mxu1  ;;  %v1375_v5 = vpop.f32.mrf.mxu0 }
 0x5a8   : > { %v1378_v6 = vcombine.low %v1234_v47, %v1326_v4  ;;  %v1379_v7 = vcombine.high %v1234_v47, %v1326_v4 }
 0x5a9   : > { %v2029_v9 = vpop.f32.mrf.mxu1  ;;  %v2036_v10 = vpop.f32.mrf.mxu0 }
 0x5aa   : > { %v1386_v13 = vrot.slane %v1378_v6, %v2403_v35  ;;  %v1393_v14 = vrot.slane %v1379_v7, %v2403_v35  ;;  %v1928_v9 = vld [vmem:[%s2668_s6] ss:$0 sm:$0xff] }
 0x5ab   : > { %v1329_v15 = vpop.f32.mrf.mxu1 }
 0x5ac   : > { %v1410_v16 = vcombine.low %v1386_v13, %v1402_v11  ;;  %v1411_v17 = vcombine.high %v1386_v13, %v1402_v11  ;;  %v1426_v18 = vcombine.low %v1393_v14, %v1409_v12  ;;  %v1427_v19 = vcombine.high %v1393_v14, %v1409_v12  ;;  %v1929_v11 = vld [vmem:[%s2669_s7] ss:$0 sm:$0xff]  ;;  %v2136_v15 = vld [vmem:[%s2672_s10 + $0x38] sm:$0xff]  }
 0x5ad   : > { %v2030_v21 = vpop.f32.mrf.mxu1 }
 0x5ae   : > { %v1418_v23 = vrot.slane %v1410_v16, %v2405_v41  ;;  %v1425_v24 = vrot.slane %v1411_v17, %v2405_v41  ;;  %v1434_v25 = vrot.slane %v1426_v18, %v2405_v41  ;;  %v1441_v26 = vrot.slane %v1427_v19, %v2405_v41  ;;  %v2137_v16 = vld [vmem:[%s2672_s10 + $0x30] sm:$0xff]   ;;  %v2138_v17 = vld [vmem:[%s2672_s10 + $0x28] sm:$0xff]   ;;  %v2139_v18 = vld [vmem:[%s2672_s10 + $0x20] sm:$0xff]  }
 0x5af   : > { %v2140_v19 = vld [vmem:[%s2672_s10 + $0x18] sm:$0xff]   ;;  %v2141_v21 = vld [vmem:[%s2672_s10 + $0x10] sm:$0xff]  }
 0x5b0   : > { %v1446_v27 = vcombine.low %v1418_v23, %v1425_v24  ;;  %v1922_v28 = vcombine.high %v1418_v23, %v1425_v24  ;;  %v1462_v29 = vcombine.low %v1434_v25, %v1441_v26  ;;  %v1923_v30 = vcombine.high %v1434_v25, %v1441_v26  ;;  %v2143_v23 = vld [vmem:[%s2672_s10] sm:$0xff]  }
 0x5b1   : > { %v1930_v24 = vld [vmem:[%s2671_s9] ss:$0 sm:$0xff] }
 0x5b2   : > { %v1453_v31 = vrot.slane %v1446_v27, %v2403_v35  ;;  %v1461_v32 = vrot.slane %v1922_v28, %v2403_v35  ;;  %v1469_v33 = vrot.slane %v1462_v29, %v2403_v35  ;;  %v1477_v34 = vrot.slane %v1923_v30, %v2403_v35 }
 0x5b4   : > { %v1479_v37 = vcombine.high %v1453_v31, %v1461_v32  ;;  %v1495_v39 = vcombine.high %v1469_v33, %v1477_v34  ;;  %v1478_v40 = vcombine.low %v1453_v31, %v1461_v32  ;;  %v1494_v42 = vcombine.low %v1469_v33, %v1477_v34 }
 0x5b6   : > { %v1493_v43 = vrot.slane %v1479_v37, %v2405_v41  ;;  %v1509_v44 = vrot.slane %v1495_v39, %v2405_v41  ;;  %v1486_v45 = vrot.slane %v1478_v40, %v2405_v41  ;;  %v1502_v46 = vrot.slane %v1494_v42, %v2405_v41 }
 0x5b8   : > { %v1512_v36 = vcombine.low %v1493_v43, %v1509_v44  ;;  %v1511_v38 = vcombine.high %v1486_v45, %v1502_v46  ;;  %v1510_v48 = vcombine.low %v1486_v45, %v1502_v46  ;;  %v1513_v35 = vcombine.high %v1493_v43, %v1509_v44  ;;  %v1942_v44 = vld [vmem:[%s2673_s11] ss:$0 sm:$0xff] }
 0x5ba   : > { %1519 = vrot.lane.b32.xlu1 %v1512_v36, %s2243_s16  ;;  %1515 = vrot.lane.b32.xlu0 %v1511_v38, %s2244_s17  ;;  %s404_s16 = scalar_lea.vmem [#allocation2], %s1897_s26 }
 0x5bb   : > { %s1834_s17 = sshll.u32 %s404_s16, 4  ;;  %s2622_s17 = int_to_ptr.vmem [resolvable:$true] %s1834_s17 }
 0x5bc   : > { %s2166_s26 = scalar_lea.vmem %s2622_s17, 128  ;;  %p2173_p0 = scmp.lt.s32.totalorder %s2622_s17, %s2171_s29 }
 0x5bd   : > { %p2167_p11 = scmp.ne.s32.totalorder %s2622_s17, %s2166_s26  ;;  %p2174_p1 = scmp.lt.s32.totalorder %s2172_s15, %s2166_s26 }
 0x5be   : > { %1523 = vrot.lane.b32.xlu0 %v1513_v35, %s2245_s18 }
 0x5bf   : > { %p2168_p12 = pnand %p2167_p11, %p2350_p5  ;;  %p2175_p2 = por %p2174_p1, %p2173_p0 }
 0x5c1   : > { %p2169_p13 = pneg %p2168_p12 }
 0x5c3   : > { %p2176_p3 = pnand %p2175_p2, %p2169_p13 }
 0x62c   : > { %v1516_v50 = vpop.permute.xlu0 %1515  ;;  %v1520_v20 = vpop.permute.xlu1 %1519 }
 0x62d   : > { %v1526_v51 = vsel %vm956_vm2, %v1510_v48, %v1516_v50 }
 0x62e   : > { %v1528_v53 = vsel %vm1527_vm4, %v1526_v51, %v1520_v20 }
 0x630   : > { %v1524_v52 = vpop.permute.xlu0 %1523 }
 0x631   : > { %v1530_v54 = vsel %vm1529_vm5, %v1528_v53, %v1524_v52 }
 0x632   : > { %v1531_v41 = vpack.c.bf16 %v1530_v54, %v1530_v54 }
 0x634   : > { %2042 = vmatmul.mubr.msk.bf16.vlgmr.msra.gmra.mxu1 %vm413_vm0, %v1531_v41 }
 0x635   : > { %2069 = vmatprep.mubr.msk.bf16.mxu1 %vm2229_vm1, %v2228_v8  ;;  %2054 = vmatpush3.bf16.msra.mxu1 %v2136_v15 }
 0x636   : > { %2055 = vmatprep.subr.bf16.mxu1 %v2228_v8 }
 0x639   : > { %2056 = vmatpush3.bf16.msra.mxu1 %v2137_v16 }
 0x63a   : > { %2057 = vmatprep.subr.bf16.mxu1 %v2228_v8 }
 0x63d   : > { %2058 = vmatpush3.bf16.msra.mxu1 %v2138_v17 }
 0x63e   : > { %2059 = vmatprep.subr.bf16.mxu1 %v2228_v8 }
 0x641   : > { %2060 = vmatpush3.bf16.msra.mxu1 %v2139_v18 }
 0x642   : > { %2061 = vmatprep.subr.bf16.mxu1 %v2228_v8 }
 0x645   : > { %2062 = vmatpush3.bf16.msra.mxu1 %v2140_v19 }
 0x646   : > { %2063 = vmatprep.subr.bf16.mxu1 %v2228_v8 }
 0x649   : > { %2064 = vmatpush3.bf16.msra.mxu1 %v2141_v21 }
 0x64a   : > { %2065 = vmatprep.subr.bf16.mxu1 %v2228_v8 }
 0x64d   : > { %2066 = vmatpush3.bf16.msra.mxu1 %v2142_v22 }
 0x64e   : > { %2067 = vmatprep.subr.bf16.mxu1 %v2228_v8 }
 0x651   : > { %2068 = vmatpush3.bf16.msra.mxu1 %v2143_v23 }
 0x6f4   : > { %v1585_v55 = vpop.f32.mrf.mxu1 }
 0x6f5   : > { %v1591_v47 = vadd.f32 %v1585_v55, %v2365_v0  ;;  %v2134_v0 = vld [vmem:[%s2670_s8 + $0x8] sm:$0xff]  }
 0x6f6   : > { %v2043_v57 = vpop.f32.mrf.mxu1  ;;  %2046 = vmatpush3.bf16.msra.mxu0 %v2134_v0 }
 0x6f7   : > { %v2557_v58 = vadd.f32 %v1927_v56, %v1591_v47  ;;  %2047 = vmatprep.subr.bf16.mxu0 %v2228_v8 }
 0x6f8   : > { %v1588_v49 = vpop.f32.mrf.mxu1 }
 0x6f9   : > { %v1602_v59 = vsel %vm413_vm0, %v2557_v58, 0.0 }
 0x6fa   : > { %1603 = vadd.xlane.f32.xlu1 %v1602_v59  ;;  %v2044_v60 = vpop.f32.mrf.mxu1  ;;  %2048 = vmatpush3.bf16.msra.mxu0 %v2135_v3 }
 0x783   : > { %v1604_v61 = vpop.xlane.xlu1 %1603 }
 0x784   : > { %v1605_v62 = vmul.f32 0.03125, %v1604_v61 }
 0x786   : > { %v1606_v63 = vsub.f32 %v2557_v58, %v1605_v62 }
 0x788   : > { %v1607_v1 = vmul.f32 %v1606_v63, %v1606_v63 }
 0x78a   : > { %v1608_v2 = vsel %vm413_vm0, %v1607_v1, 0.0 }
 0x78b   : > { %1609 = vadd.xlane.f32.xlu0 %v1608_v2 }
 0x814   : > { %v1610_v4 = vpop.xlane.xlu0 %1609 }
 0x815   : > { %v1611_v5 = vmul.f32 0.03125, %v1610_v4 }
 0x817   : > { %v1612_v6 = vadd.f32 1e-05, %v1611_v5 }
 0x819   : > { %2162 = vrsqrt.f32 %v1612_v6 }
 0x826   : > { %v2163_v7 = vpop.eup %2162 }
 0x827   : > { %v1614_v10 = vmul.f32 %v2163_v7, %v1606_v63 }
 0x829   : > { %v1621_v12 = vmul.f32 %v1928_v9, %v1614_v10 }
 0x82b   : > { %v1628_v13 = vadd.f32 %v1929_v11, %v1621_v12 }
 0x82d   : > { %v1629_v14 = vpack.c.bf16 %v1628_v13, %v1628_v13 }
 0x82f   : > { %2050 = vmatmul.mubr.msk.bf16.vlgmr.msra.gmra.mxu0 %vm413_vm0, %v1629_v14 }
 0x8ef   : > { %v1690_v25 = vpop.f32.mrf.mxu0 }
 0x8f0   : > { %v1691_v26 = vadd.f32 %v1930_v24, %v1690_v25 }
 0x8f1   : > { %v2051_v27 = vpop.f32.mrf.mxu0 }
 0x8f2   : > { %v1697_v28 = vmul.f32 0.044715, %v1691_v26  ;;  %v1696_v8 = vmul.f32 0.5, %v1691_v26 }
 0x8f3   : > { %v1693_v29 = vpop.f32.mrf.mxu0 }
 0x8f4   : > { %v1698_v30 = vmul.f32 %v1697_v28, %v1691_v26 }
 0x8f5   : > { %v2052_v31 = vpop.f32.mrf.mxu0 }
 0x8f6   : > { %v1699_v32 = vmul.f32 %v1698_v30, %v1691_v26 }
 0x8f8   : > { %v1700_v33 = vadd.f32 %v1699_v32, %v1691_v26 }
 0x8fa   : > { %v1701_v34 = vmul.f32 0.7978846, %v1700_v33 }
 0x8fc   : > { %2164 = vtanh.f32 %v1701_v34 }
 0x909   : > { %v2165_v37 = vpop.eup %2164 }
 0x90a   : > { %v1703_v39 = vadd.f32 1.0, %v2165_v37 }
 0x90c   : > { %v1704_v40 = vmul.f32 %v1703_v39, %v1696_v8 }
 0x90e   : > { %v1705_v42 = vpack.c.bf16 %v1704_v40, %v1704_v40 }
 0x910   : > { %2070 = vmatmul.mubr.bf16.vlgmr.msra.gmra.mxu1 %v1705_v42 }
 0x9d0   : > { %v1804_v43 = vpop.f32.mrf.mxu1 }
 0x9d1   : > { %v1810_v45 = vadd.f32 %v1804_v43, %v2557_v58 }
 0x9d2   : > { %v2071_v46 = vpop.f32.mrf.mxu1 }
 0x9d3   : > { %v1818_v36 = vadd.f32 %v1942_v44, %v1810_v45 }
 0x9d4   : > { %v1807_v38 = vpop.f32.mrf.mxu1 }
 0x9d5   : > { %1819 = vst.msk [vmem:[%s404_s16] sm:$0xff] %vm413_vm0, %v1818_v36 }
 0x9d6   : > { %v2072_v48 = vpop.f32.mrf.mxu1 }
 0x9d7   : > { %2179 = shalt.err (!%p2176_p3)
}
 0x9d8   : > { %s2180_s16 = scalar_lea.hbm %s2620_s0, 128  ;;  %s2184_s19 = scalar_lea.hbm %s2674_s12, 256 }
 0x9d9   : > { %p2181_p4 = scmp.ne.s32.totalorder %s2620_s0, %s2180_s16  ;;  %p2185_p9 = scmp.lt.s32.totalorder %s2620_s0, %s2674_s12 }
 0x9da   : > { %p2186_p10 = scmp.lt.s32.totalorder %s2184_s19, %s2180_s16 }
 0x9db   : > { %p2182_p7 = pnand %p2181_p4, %p2350_p5 }
 0x9dc   : > { %p2187_p11 = por %p2186_p10, %p2185_p9 }
 0x9dd   : > { %p2183_p8 = pneg %p2182_p7 }
 0x9df   : > { %p2188_p12 = pnand %p2187_p11, %p2183_p8 }
 0x9e1   : > { %2191 = shalt.err (!%p2188_p12)
}
 0x9e2   : > { %2073 = dma.vmem_to_hbm [thread:$0]  (%p2350_p5), %s2622_s17, 128, %s2620_s0, %s1821_s25  }
 0x9e3 PF: > { %p2079_p13 = scmp.ge.s32.totalorder %s2226_s24, 2  ;;  %s1846_s26 = sand.u32 1, %s2214_s21  }
 0x9e4   : > { %s1847_s1 = scalar_lea.sflag [#allocation3], %s1846_s26 }
 0x9e5   : > { %p2076_p0 = pnand %p2079_p13, %p2354_p6 }
 0x9e7   : > { %p2077_p1 = pneg %p2076_p0 }
 0x9e9   : > { %2209 = dma.done.wait (%p2077_p1), %s1847_s1, 128  }
 0x9ea   : > { %2211 = vsyncadd (%p2077_p1), %s1847_s1, 4294967168  ;;  %p22_p2 = scmp.ge.s32.totalorder %s2337_s27, 4   ;;  %s2681_s21 = smov %s2218_s22 }
 0x9eb   : > { %s2682_s22 = smov %s2222_s23  ;;  %s2683_s23 = smov %s2348_s30 }
 0x9ec   : > { %s2684_s24 = smov %s2337_s27  ;;  %24 = sbr.rel (!%p22_p2) target bundleno = 6 (0x6), region = 103 }
 0x9f1   :  { %1852 = vsyncpa [#allocation3], 1 }
 0x9f2   :  { %1854 = vsyncpa [#allocation3 + $0x1], 1 }

</bundles_post_ra>
